<compile_context>
chip_gen: v5e
topology: v5e:2x2
jax: 0.10.0
libtpu: 0.0.40
codegen_flags: <defaults>
</compile_context>

<pallas_src>
import functools

import jax
import jax.numpy as jnp
from jax.experimental import pallas as pl
from jax.experimental.pallas import tpu as pltpu

_LANE = 128
_T_HW_CAP = 32768          # lane-tile hard cap (keeps blocks a sane size)
_BN_CAP = 32               # batch-fold hard cap (bounds kernel unroll)


def _cdiv(a, b):
    return -(-a // b)


def _largest_divisor_le(n, cap):
    cap = max(1, min(n, cap))
    for d in range(cap, 0, -1):
        if n % d == 0:
            return d
    return 1


def _plan(N, Cin, Cout, HW, itemsize, t_hw=None, bn=None):
    """Pick (t_hw, bn, vmem_limit_bytes) — all static Python ints."""
    try:
        phys_vmem = int(pltpu.get_tpu_info().vmem_capacity_bytes)
    except Exception:  # conservative fallback (v7x-class)
        phys_vmem = 64 << 20

    # Generation-aware budget for the double-buffered (in + out) blocks:
    # v7x (64 MiB physical, shared with compiler scratch) -> 24 MiB,
    # v5e/v6e (128 MiB physical)                          -> 48 MiB.
    vmem_budget = (24 << 20) if phys_vmem <= (64 << 20) else (48 << 20)

    per_lane = (Cin + Cout) * itemsize                    # in+out bytes / (batch, lane)
    max_lanes = max(_LANE, vmem_budget // (2 * per_lane))  # bn * t_hw cap (double-buffered)

    # --- spatial tile -------------------------------------------------------
    if t_hw is None:
        if HW <= min(_T_HW_CAP, max_lanes):
            t_hw = HW                                      # full-extent block (always legal)
        else:
            t_hw = max(_LANE, (min(HW, _T_HW_CAP, max_lanes) // _LANE) * _LANE)
    n_hw = _cdiv(HW, t_hw)

    # --- batch fold ---------------------------------------------------------
    if bn is None:
        target_bytes = 2 << 20                             # amortize ~0.35us/step overhead
        bn_cap = min(N,
                     max(1, max_lanes // t_hw),
                     _cdiv(target_bytes, per_lane * t_hw),
                     _BN_CAP)
        bn = _largest_divisor_le(N, bn_cap)                # divisor of N: no ragged batch blocks
        n_b = _cdiv(N, bn)

        # v7x has 2 TensorCores: prefer >= 2 grid steps on a parallel axis
        # (cheap on single-TC chips too — one extra ~0.35us step at most).
        if n_b * n_hw < 2 and N >= 2:
            bn = _largest_divisor_le(N, max(1, N // 2))
            n_b = _cdiv(N, bn)
        if n_b * n_hw < 2 and HW >= 2 * _LANE:
            t_hw = max(_LANE, ((HW // 2) // _LANE) * _LANE)
            n_hw = _cdiv(HW, t_hw)

    # Explicit scoped-VMEM limit: double-buffered in+out blocks + resident
    # weight/bias + headroom for internal scratch.  Never exceed physical VMEM.
    vmem_limit = 2 * bn * t_hw * per_lane + (Cout * Cin + Cout) * itemsize + (8 << 20)
    vmem_limit = int(min(phys_vmem, max(32 << 20, vmem_limit)))
    return int(t_hw), int(bn), vmem_limit


def _conv1x1_kernel(x_ref, w_ref, b_ref, o_ref):
    # x_ref: (Bn, Cin, T)   w_ref: (Cout, Cin)   b_ref: (Cout, 1)   o_ref: (Bn, Cout, T)
    w = w_ref[...]
    b = b_ref[...]
    # Bn is small and static -> unrolled; each iteration is a clean 2-D MXU matmul
    # with f32 accumulation and the bias added in f32 (matches Conv2d semantics).
    for i in range(x_ref.shape[0]):
        acc = jnp.dot(w, x_ref[i], preferred_element_type=jnp.float32)
        o_ref[i] = (acc + b).astype(o_ref.dtype)


@functools.partial(jax.jit, static_argnames=("t_hw", "bn", "vmem_limit"))
def _conv1x1_call(x_nchw, weight, bias, *, t_hw, bn, vmem_limit):
    N, Cin, H, W = x_nchw.shape
    Cout = weight.shape[0]
    HW = H * W

    # Free reshapes (no data movement): channels second, spatial last.
    x3d = x_nchw.reshape(N, Cin, HW)
    w2d = weight.reshape(Cout, Cin)
    b2d = bias.reshape(Cout, 1)

    n_b = _cdiv(N, bn)
    n_hw = _cdiv(HW, t_hw)

    itemsize = jnp.dtype(x_nchw.dtype).itemsize
    flops = 2 * N * HW * Cin * Cout
    bytes_accessed = (N * HW * (Cin + Cout) + Cout * Cin + Cout) * itemsize

    out3d = pl.pallas_call(
        _conv1x1_kernel,
        out_shape=jax.ShapeDtypeStruct((N, Cout, HW), x_nchw.dtype),
        grid_spec=pltpu.PrefetchScalarGridSpec(
            num_scalar_prefetch=0,
            grid=(n_b, n_hw),
            in_specs=[
                # x block: (Bn, Cin, t_hw); Cin is full-extent, t_hw is a multiple
                # of 128 or the full HW extent.
                pl.BlockSpec((bn, Cin, t_hw), lambda b, s: (b, 0, s)),
                # full weight, grid-invariant -> stays resident in VMEM
                pl.BlockSpec((Cout, Cin), lambda b, s: (0, 0)),
                # bias column, grid-invariant
                pl.BlockSpec((Cout, 1), lambda b, s: (0, 0)),
            ],
            # lane-dense output block: last dim is the spatial tile
            out_specs=pl.BlockSpec((bn, Cout, t_hw), lambda b, s: (b, 0, s)),
        ),
        compiler_params=pltpu.CompilerParams(
            dimension_semantics=("parallel", "parallel"),
            vmem_limit_bytes=vmem_limit),
        cost_estimate=pl.CostEstimate(
            flops=flops, transcendentals=0, bytes_accessed=bytes_accessed),
    )(x3d, w2d, b2d)

    # Free reshape back to NCHW — no transpose needed.
    return out3d.reshape(N, Cout, H, W)


def linear_1x1(x_nchw, weight, bias, *, t_hw=None, bn=None):
    """Forward of GraphWaveNet's `linear` (= nn.Conv2d(c_in, c_out, 1, bias=True)).

    x_nchw: (N, C_in, H, W); weight: (C_out, C_in, 1, 1); bias: (C_out,).
    Returns (N, C_out, H, W).  Optional t_hw / bn override the auto tiling plan
    (t_hw must be a multiple of 128 or equal H*W; bn must divide N).
    """
    N, Cin, H, W = x_nchw.shape
    Cout = weight.shape[0]
    itemsize = jnp.dtype(x_nchw.dtype).itemsize
    t_hw, bn, vmem_limit = _plan(N, Cin, Cout, H * W, itemsize, t_hw=t_hw, bn=bn)
    return _conv1x1_call(x_nchw, weight, bias, t_hw=t_hw, bn=bn, vmem_limit=vmem_limit)


def _init_params(key, c_in, c_out, dtype=jnp.float32):
    # Deterministic init mimicking torch.nn.Conv2d defaults
    # (kaiming-uniform weight, uniform bias with bound 1/sqrt(fan_in)).
    kw, kb = jax.random.split(key)
    fan_in = c_in  # kernel_size = 1x1
    w_bound = (6.0 / fan_in) ** 0.5 / (5.0 ** 0.5)
    b_bound = 1.0 / (fan_in ** 0.5)
    weight = jax.random.uniform(kw, (c_out, c_in, 1, 1), dtype,
                                minval=-w_bound, maxval=w_bound)
    bias = jax.random.uniform(kb, (c_out,), dtype,
                              minval=-b_bound, maxval=b_bound)
    return weight, bias


def _ref_conv1x1(x, weight, bias):
    c_out, c_in = weight.shape[0], weight.shape[1]
    return (jnp.einsum("nchw,oc->nohw", x, weight.reshape(c_out, c_in))
            + bias.reshape(1, c_out, 1, 1))


if __name__ == "__main__":
    key = jax.random.PRNGKey(0)
    k_x, k_p, k_x2, k_x3 = jax.random.split(key, 4)

    # Small shapes consistent with GraphWaveNet usage: (batch, channels, nodes, seq)
    N, c_in, H, W = 2, 4, 16, 8
    c_out = 32

    x = jax.random.normal(k_x, (N, c_in, H, W), jnp.float32)
    weight, bias = _init_params(k_p, c_in, c_out)

    out = jax.block_until_ready(linear_1x1(x, weight, bias))
    ref = _ref_conv1x1(x, weight, bias)
    assert out.shape == (N, c_out, H, W)
    assert jnp.allclose(out, ref, atol=1e-5, rtol=1e-5)

    # Case 2: HW not a multiple of 128 -> full-extent spatial block (no raggedness),
    # exercises the auto plan's megacore split over the batch axis.
    H2, W2 = 16, 9
    x2 = jax.random.normal(k_x2, (N, c_in, H2, W2), jnp.float32)
    out2 = jax.block_until_ready(linear_1x1(x2, weight, bias))
    ref2 = _ref_conv1x1(x2, weight, bias)
    assert out2.shape == (N, c_out, H2, W2)
    assert jnp.allclose(out2, ref2, atol=1e-5, rtol=1e-5)

    # Case 3: forced multi-tile grid with a ragged last spatial tile AND a batched
    # block (bn=2): HW = 288 -> spatial tiles of 128, 128, 32-valid.
    N3, H3, W3 = 4, 16, 18
    x3 = jax.random.normal(k_x3, (N3, c_in, H3, W3), jnp.float32)
    out3 = jax.block_until_ready(linear_1x1(x3, weight, bias, t_hw=128, bn=2))
    ref3 = _ref_conv1x1(x3, weight, bias)
    assert out3.shape == (N3, c_out, H3, W3)
    assert jnp.allclose(out3, ref3, atol=1e-5, rtol=1e-5)

    print("KERNEL_OK")
</pallas_src>

<mosaic_0001>
module attributes {stable_mosaic.version = 11 : i64} {
  func.func @_conv1x1_kernel(%arg0: i32, %arg1: i32, %arg2: memref<1x4x128xf32, #tpu.memory_space<vmem>>, %arg3: memref<32x4xf32, #tpu.memory_space<vmem>>, %arg4: memref<32x1xf32, #tpu.memory_space<vmem>>, %arg5: memref<1x32x128xf32, #tpu.memory_space<vmem>>) attributes {dimension_semantics = [#tpu.dimension_semantics<parallel>, #tpu.dimension_semantics<parallel>], iteration_bounds = array<i64: 2, 1>, scalar_prefetch = 0 : i64, scratch_operands = 0 : i64, tpu.core_type = #tpu.core_type<tc>, window_params = [{transform_indices = @transform_0, window_bounds = array<i64: 1, 4, 128>}, {pipeline_mode = #tpu.pipeline_mode<synchronous>, transform_indices = @transform_1, window_bounds = array<i64: 32, 4>}, {pipeline_mode = #tpu.pipeline_mode<synchronous>, transform_indices = @transform_2, window_bounds = array<i64: 32, 1>}, {transform_indices = @transform_3, window_bounds = array<i64: 1, 32, 128>}]} {
    %c0 = arith.constant 0 : index
    %c0_0 = arith.constant 0 : index
    %0 = vector.load %arg3[%c0, %c0_0] : memref<32x4xf32, #tpu.memory_space<vmem>>, vector<32x4xf32>
    %c0_1 = arith.constant 0 : index
    %c0_2 = arith.constant 0 : index
    %1 = vector.load %arg4[%c0_1, %c0_2] : memref<32x1xf32, #tpu.memory_space<vmem>>, vector<32x1xf32>
    %c0_3 = arith.constant 0 : index
    %c0_4 = arith.constant 0 : index
    %c0_5 = arith.constant 0 : index
    %2 = vector.load %arg2[%c0_3, %c0_4, %c0_5] : memref<1x4x128xf32, #tpu.memory_space<vmem>>, vector<1x4x128xf32>
    %3 = vector.shape_cast %2 : vector<1x4x128xf32> to vector<4x128xf32>
    %cst = arith.constant dense<0.000000e+00> : vector<32x128xf32>
    %4 = tpu.matmul %0, %3, %cst {dimension_numbers = #tpu.dot_dimension_numbers<[1], [0], [0], [1], [0, 0, 1, 1], [], []>} : vector<32x4xf32>, vector<4x128xf32>, vector<32x128xf32> -> vector<32x128xf32>
    %5 = vector.broadcast %1 : vector<32x1xf32> to vector<32x128xf32>
    %6 = arith.addf %4, %5 : vector<32x128xf32>
    %c0_6 = arith.constant 0 : index
    %c0_7 = arith.constant 0 : index
    %c0_8 = arith.constant 0 : index
    %7 = vector.load %arg5[%c0_6, %c0_7, %c0_8] : memref<1x32x128xf32, #tpu.memory_space<vmem>>, vector<1x32x128xf32>
    %8 = vector.shape_cast %7 : vector<1x32x128xf32> to vector<32x128xf32>
    %9 = vector.shape_cast %6 : vector<32x128xf32> to vector<1x32x128xf32>
    tpu.vector_store %arg5[%c0_6, %c0_7, %c0_8], %9 {strides = array<i32>} : memref<1x32x128xf32, #tpu.memory_space<vmem>>, vector<1x32x128xf32>,
    return
  }
  func.func @transform_0(%arg0: i32, %arg1: i32) -> (i32, i32, i32) {
    %c0_i32 = arith.constant 0 : i32
    %c0_i32_0 = arith.constant 0 : i32
    return %arg0, %c0_i32, %arg1 : i32, i32, i32
  }
  func.func @transform_1(%arg0: i32, %arg1: i32) -> (i32, i32) {
    %c0_i32 = arith.constant 0 : i32
    %c0_i32_0 = arith.constant 0 : i32
    %c0_i32_1 = arith.constant 0 : i32
    return %c0_i32, %c0_i32_0 : i32, i32
  }
  func.func @transform_2(%arg0: i32, %arg1: i32) -> (i32, i32) {
    %c0_i32 = arith.constant 0 : i32
    %c0_i32_0 = arith.constant 0 : i32
    %c0_i32_1 = arith.constant 0 : i32
    return %c0_i32, %c0_i32_0 : i32, i32
  }
  func.func @transform_3(%arg0: i32, %arg1: i32) -> (i32, i32, i32) {
    %c0_i32 = arith.constant 0 : i32
    %c0_i32_0 = arith.constant 0 : i32
    return %arg0, %c0_i32, %arg1 : i32, i32, i32
  }
}

</mosaic_0001>

<bundles_post_ra>
// kernel: _conv1x1_call.1
= control target key start
LH: loop header
LB: loop body
LE: loop exit
PB: predicated region body
PF: predicated region fallthrough
CT: control target
= control target key end

     0   :  { %s449_s12 = smov 0   ;;  %s451_s13 = smov 0   ;;  %s510_s0 = inlined_call_operand.vmem [shape: f32[2,4,128], index: 0, kind: input, shape index: {}]   ;;  %s511_s1 = inlined_call_operand.vmem [shape: f32[32,4], index: 1, kind: input, shape index: {}]   ;;  %s512_s2 = inlined_call_operand.vmem [shape: f32[32,1], index: 2, kind: input, shape index: {}]   ;;  %s513_s3 = inlined_call_operand.vmem [shape: f32[2,32,128], index: 3, kind: output, shape index: {}]  }
   0x1   :  { %s453_s14 = smov 0  }
   0x2 LB: > { %s25_s15 = sadd.s32 1, %s422_s13  ;;  %p362_p0 = scmp.ge.s32.totalorder %s426_s14, 1  ;;  %s426_s14 = sphi %s453_s14, %s13_s14   ;;  %s422_s13 = sphi %s451_s13, %s515_s13   ;;  %s418_s12 = sphi %s449_s12, %s514_s12  }
   0x3   : > { %p27_p1 = scmp.ge.s32.totalorder %s25_s15, 2  ;;  %p155_p2 = scmp.lt.s32.totalorder %s426_s14, 3 }
   0x5   : > { %s517_s15 = smov (%p27_p1, %s25_s15), 0  ;;  %p156_p3 = pnand %p362_p0, %p155_p2 }
   0x6   : > { %p184_p4 = scmp.lt.s32.totalorder (!%p156_p3), %s418_s12, 1 }
   0x7   : > { %159 = sbr.rel (%p156_p3) target bundleno = 155 (0x9b), region = 32 }
   0xc   : > { %v428_v0 = vmov 0   ;;  %v205_v1 = vld [vmem:[%s512_s2 + $0x10] sm:$0xff]  ;;  %s519_s12 = smov (!%p184_p4, %s418_s12), 1  ;;  %v203_v2 = vld [vmem:[%s512_s2] sm:$0xff]  ;;  %vm241_vm0 = vcmask 1043456   ;;  %vm228_vm1 = vcmask 31744  }
   0xd   : > { %403 = vset.pattern.permute.xlu1 %v428_v0  ;;  %402 = vset.pattern.permute.xlu0 %v428_v0  ;;  %s363_s20 = sshll.u32 %s519_s12, 2  ;;  %v199_v4 = vld [vmem:[%s511_s1] sm:$0xff]  ;;  %v200_v5 = vld [vmem:[%s511_s1 + $0x8] sm:$0xff]  ;;  %v201_v6 = vld [vmem:[%s511_s1 + $0x10] sm:$0xff]  ;;  %s373_s9 = sshll.u32 %s519_s12, 5 }
   0xe   : > { %220 = vperm.xlu1 %403, %v205_v1   ;;  %210 = vperm.xlu0 %402, %v203_v2   ;;  %s190_s23 = scalar_lea.vmem %s510_s0, %s363_s20  ;;  %v202_v7 = vld [vmem:[%s511_s1 + $0x18] sm:$0xff]  ;;  %v204_v9 = vld [vmem:[%s512_s2 + $0x8] sm:$0xff]  ;;  %s198_s16 = scalar_lea.vmem %s513_s3, %s373_s9 }
   0xf   : > { %v207_v3 = vld [vmem:[%s190_s23] sm:$0xf]  ;;  %v206_v8 = vld [vmem:[%s512_s2 + $0x18] sm:$0xff] }
  0x10   : > { %366 = vmatpush.msk.msra.mxu0 %vm241_vm0, %v207_v3  ;;  %374 = vmatpush.msk.msra.mxu1 %vm241_vm0, %v207_v3 }
  0x11   : > { %375 = vmatpush.msk.msra.mxu2 %vm241_vm0, %v207_v3  ;;  %376 = vmatpush.msk.msra.mxu3 %vm241_vm0, %v207_v3 }
  0x12   : > { %367 = vmatmul.msk.f32.vlgmr.msra.gmra.mxu0 %vm228_vm1, %v199_v4  ;;  %368 = vmatmul.msk.f32.vlgmr.msra.gmra.mxu1 %vm228_vm1, %v200_v5 }
  0x13   : > { %369 = vmatmul.msk.f32.vlgmr.msra.gmra.mxu2 %vm228_vm1, %v201_v6  ;;  %370 = vmatmul.msk.f32.vlgmr.msra.gmra.mxu3 %vm228_vm1, %v202_v7 }
  0x16   : > { %225 = vperm.xlu1 %403, %v206_v8   ;;  %215 = vperm.xlu0 %402, %v204_v9  }
  0x80   : > { %v211_v10 = vpop.permute.xlu0 %210  ;;  %v221_v11 = vpop.permute.xlu1 %220 }
  0x88   : > { %v216_v12 = vpop.permute.xlu0 %215  ;;  %v226_v17 = vpop.permute.xlu1 %225 }
  0x8f   : > { %v262_v13 = vpop.f32.mrf.mxu0  ;;  %v265_v14 = vpop.f32.mrf.mxu1 }
  0x90   : > { %v263_v15 = vadd.f32 %v262_v13, %v211_v10  ;;  %v266_v16 = vadd.f32 %v265_v14, %v216_v12 }
  0x92   : > { %274 = vst [vmem:[%s198_s16] sm:$0xff] %v263_v15 }
  0x93   : > { %275 = vst [vmem:[%s198_s16 + $0x8] sm:$0xff] %v266_v16 }
  0x96   : > { %v268_v18 = vpop.f32.mrf.mxu2  ;;  %v271_v19 = vpop.f32.mrf.mxu3 }
  0x97   : > { %v269_v20 = vadd.f32 %v268_v18, %v221_v11  ;;  %v272_v21 = vadd.f32 %v271_v19, %v226_v17 }
  0x99   : > { %276 = vst [vmem:[%s198_s16 + $0x10] sm:$0xff] %v269_v20 }
  0x9a   : > { %277 = vst [vmem:[%s198_s16 + $0x18] sm:$0xff] %v272_v21 }
  0x9b PF: > { %s13_s14 = sadd.s32 1, %s426_s14   ;;  %s514_s12 = smov %s422_s13 }
  0x9c   : > { %p10_p5 = scmp.ge.s32.totalorder %s13_s14, 4   ;;  %s515_s13 = smov %s517_s15 }
  0x9e   :  { %12 = sbr.rel (!%p10_p5) target bundleno = 2 (0x2), region = 62 }

</bundles_post_ra>
